<compile_context>
chip_gen: v5e
topology: v5e:2x2
jax: 0.10.0
libtpu: 0.0.40
codegen_flags: <defaults>
</compile_context>

<pallas_src>
import functools

import jax
import jax.numpy as jnp
from jax.experimental import pallas as pl
from jax.experimental.pallas import tpu as pltpu


# ---------------------------------------------------------------------------
# kernel
# ---------------------------------------------------------------------------
def _sym_focal_kernel(p_ref, t_ref, out_ref, *, delta, gamma, epsilon,
                      r_tile, s0_valid, ragged):
    """One grid step: partial loss sum over a (2, r_tile, s1) slab.

    grid = (batch, spatial_tile); both axes are independent ("parallel"):
    each step writes its own (1, 1, 1, 1) partial-sum block, so there is no
    carried accumulator and no required axis ordering.
    """
    p = p_ref[...].astype(jnp.float32)          # (1, 2, r_tile, s1)
    t = t_ref[...].astype(jnp.float32)

    # clamp -> log (EUP slot, effectively free) ; (1-p)^gamma on the VPU
    p = jnp.clip(p, epsilon, 1.0 - epsilon)
    lg = jnp.log(p)
    om = 1.0 - p
    if gamma == 2.0:                            # default: single square
        mod = om * om
    elif gamma == 1.0:
        mod = om
    elif gamma == 0.0:
        mod = None                              # skip the multiply entirely
    else:
        mod = jnp.power(om, jnp.float32(gamma))

    contrib = t * lg                            # sign folded into the epilogue
    if mod is not None:
        contrib = contrib * mod                 # ~6 VPU ops / element / channel

    if ragged:
        # Last spatial tile reads past the array; those rows hold undefined
        # data (possibly NaN), so the *contribution* is zeroed with a select.
        row = (pl.program_id(1) * r_tile
               + jax.lax.broadcasted_iota(jnp.int32, contrib.shape, 2))
        contrib = jnp.where(row < s0_valid, contrib, 0.0)

    back = jnp.sum(contrib[0, 0])               # channel 0 (background)
    fore = jnp.sum(contrib[0, 1])               # channel 1 (foreground)
    total = -((1.0 - delta) * back + delta * fore)
    out_ref[...] = jnp.broadcast_to(total, out_ref.shape)


# ---------------------------------------------------------------------------
# wrapper
# ---------------------------------------------------------------------------
def _vmem_capacity_bytes():
    try:
        return int(pltpu.get_tpu_info().vmem_capacity_bytes)
    except Exception:
        return 64 << 20  # conservative default (v7x: 64 MiB per TensorCore)


def _pick_r_tile(s0, s1, dsize, vmem_cap):
    # in-flight input VMEM = 2 inputs * 2 pipeline buffers * 2 channels
    #                        * r_tile * s1 * dsize
    budget = min(vmem_cap // 4, 24 << 20)       # respect v7x's 64 MiB/TC
    r = budget // (8 * s1 * dsize)
    r = min(r, 1024)                            # plenty to amortize grid-step cost
    r = max(16, (r // 16) * 16)                 # multiple of 16 (bf16 sublane pack)
    if r >= s0:
        return s0                               # full-dim block: always layout-legal
    return r


def symmetric_focal_loss(y_pred, y_true, *, delta=0.7, gamma=2.0,
                         epsilon=1e-7, r_tile=None):
    """y_pred: (N, C, H, W) probabilities; y_true: (N, C, H, W) one-hot.

    Only channels 0 (background) and 1 (foreground) are used, exactly like the
    PyTorch module.  Inputs may be float32 or bfloat16.
    """
    n, c, h, w = y_pred.shape
    assert c >= 2, "SymmetricFocalLoss needs at least 2 channels"
    assert y_true.shape == y_pred.shape
    hw = h * w

    # Spatial view with a dense sublane axis (never the size-2 channel axis):
    #   HW % 128 == 0 : free reshape to (N, C, HW//128, 128)  (lane-dense)
    #   otherwise     : keep (N, C, H, W), blocks span full rows of W
    # No channel slice, no pad -> zero extra HBM passes in the wrapper.
    if hw % 128 == 0:
        s0, s1 = hw // 128, 128
        p_v = y_pred.reshape(n, c, s0, s1)
        t_v = y_true.reshape(n, c, s0, s1)
    else:
        s0, s1 = h, w
        p_v, t_v = y_pred, y_true

    dsize = max(jnp.dtype(y_pred.dtype).itemsize,
                jnp.dtype(y_true.dtype).itemsize)
    vmem_cap = _vmem_capacity_bytes()
    if r_tile is None:
        r_tile = _pick_r_tile(s0, s1, dsize, vmem_cap)
    r_tile = int(r_tile)
    assert r_tile == s0 or r_tile % 8 == 0, "r_tile must be mult. of 8 or == S0"

    n_tiles = int(pl.cdiv(s0, r_tile))
    ragged = (s0 % r_tile) != 0

    # explicit VMEM limit: double-buffered dense input blocks + headroom;
    # >= 32 MiB so v5e does not fall back to its 16 MiB scoped default.
    need = 2 * 2 * 2 * r_tile * s1 * dsize + (8 << 20)
    vmem_limit = int(min(max(need, 32 << 20), vmem_cap * 3 // 4))

    kernel = functools.partial(
        _sym_focal_kernel, delta=float(delta), gamma=float(gamma),
        epsilon=float(epsilon), r_tile=r_tile, s0_valid=s0, ragged=ragged)

    partials = pl.pallas_call(
        kernel,
        out_shape=jax.ShapeDtypeStruct((n, n_tiles, 1, 1), jnp.float32),
        grid_spec=pltpu.PrefetchScalarGridSpec(
            num_scalar_prefetch=0,
            grid=(n, n_tiles),
            in_specs=[
                # channel block of size 2 at block index 0 => channels 0..1,
                # selected by the BlockSpec (no wrapper slice even when C > 2)
                pl.BlockSpec((1, 2, r_tile, s1), lambda b, s: (b, 0, s, 0)),
                pl.BlockSpec((1, 2, r_tile, s1), lambda b, s: (b, 0, s, 0)),
            ],
            out_specs=pl.BlockSpec((1, 1, 1, 1), lambda b, s: (b, s, 0, 0)),
        ),
        compiler_params=pltpu.CompilerParams(
            dimension_semantics=("parallel", "parallel"),
            vmem_limit_bytes=vmem_limit),
    )(p_v, t_v)

    # mean over the original N*H*W pixels (trivial glue)
    return jnp.sum(partials) / jnp.float32(n * hw)


# ---------------------------------------------------------------------------
# pure-JAX reference (mirrors the PyTorch module exactly)
# ---------------------------------------------------------------------------
def symmetric_focal_loss_ref(y_pred, y_true, delta=0.7, gamma=2.0,
                             epsilon=1e-7):
    p = jnp.clip(y_pred.astype(jnp.float32), epsilon, 1.0 - epsilon)
    t = y_true.astype(jnp.float32)
    ce = -t * jnp.log(p)
    back_ce = (1.0 - delta) * jnp.power(1.0 - p[:, 0], gamma) * ce[:, 0]
    fore_ce = delta * jnp.power(1.0 - p[:, 1], gamma) * ce[:, 1]
    return jnp.mean(back_ce + fore_ce)


if __name__ == "__main__":
    key = jax.random.PRNGKey(0)
    k1, k2, k3, k4 = jax.random.split(key, 4)

    # --- main case: (2, 4, 16, 16), HW % 128 == 0 -> lane-dense (HW/128, 128)
    N, C, H, W = 2, 4, 16, 16
    logits = jax.random.normal(k1, (N, C, H, W), dtype=jnp.float32)
    y_pred = jax.nn.softmax(logits, axis=1)
    labels = jax.random.randint(k2, (N, H, W), 0, C, dtype=jnp.int32)
    y_true = jax.nn.one_hot(labels, C, axis=1, dtype=jnp.float32)

    out = symmetric_focal_loss(y_pred, y_true)
    jax.block_until_ready(out)
    ref = symmetric_focal_loss_ref(y_pred, y_true)
    assert jnp.allclose(out, ref, rtol=1e-4, atol=1e-6), (float(out), float(ref))

    # --- ragged / odd-channel case: (1, 3, 20, 16), HW % 128 != 0,
    #     forced r_tile=8 -> exercises the in-kernel row mask (no wrapper pad)
    N2, C2, H2, W2 = 1, 3, 20, 16
    logits2 = jax.random.normal(k3, (N2, C2, H2, W2), dtype=jnp.float32)
    y_pred2 = jax.nn.softmax(logits2, axis=1)
    labels2 = jax.random.randint(k4, (N2, H2, W2), 0, C2, dtype=jnp.int32)
    y_true2 = jax.nn.one_hot(labels2, C2, axis=1, dtype=jnp.float32)

    out2 = symmetric_focal_loss(y_pred2, y_true2, r_tile=8)
    jax.block_until_ready(out2)
    ref2 = symmetric_focal_loss_ref(y_pred2, y_true2)
    assert jnp.allclose(out2, ref2, rtol=1e-4, atol=1e-6), (float(out2), float(ref2))

    print("KERNEL_OK")
</pallas_src>

<mosaic_0001>
module attributes {stable_mosaic.version = 11 : i64} {
  func.func @_sym_focal_kernel(%arg0: i32, %arg1: i32, %arg2: memref<1x2x2x128xf32, #tpu.memory_space<vmem>>, %arg3: memref<1x2x2x128xf32, #tpu.memory_space<vmem>>, %arg4: memref<1x1x1x1xf32, #tpu.memory_space<vmem>>) attributes {dimension_semantics = [#tpu.dimension_semantics<parallel>, #tpu.dimension_semantics<parallel>], iteration_bounds = array<i64: 2, 1>, scalar_prefetch = 0 : i64, scratch_operands = 0 : i64, tpu.core_type = #tpu.core_type<tc>, window_params = [{transform_indices = @transform_0, window_bounds = array<i64: 1, 2, 2, 128>}, {transform_indices = @transform_1, window_bounds = array<i64: 1, 2, 2, 128>}, {transform_indices = @transform_2, window_bounds = array<i64: 1, 1, 1, 1>}]} {
    %c0 = arith.constant 0 : index
    %c0_0 = arith.constant 0 : index
    %c0_1 = arith.constant 0 : index
    %c0_2 = arith.constant 0 : index
    %0 = vector.load %arg2[%c0, %c0_0, %c0_1, %c0_2] : memref<1x2x2x128xf32, #tpu.memory_space<vmem>>, vector<1x2x2x128xf32>
    %c0_3 = arith.constant 0 : index
    %c0_4 = arith.constant 0 : index
    %c0_5 = arith.constant 0 : index
    %c0_6 = arith.constant 0 : index
    %1 = vector.load %arg3[%c0_3, %c0_4, %c0_5, %c0_6] : memref<1x2x2x128xf32, #tpu.memory_space<vmem>>, vector<1x2x2x128xf32>
    %cst = arith.constant 1.000000e-07 : f32
    %cst_7 = arith.constant 0.99999988 : f32
    %2 = vector.broadcast %cst : f32 to vector<1x2x2x128xf32>
    %3 = arith.maximumf %2, %0 : vector<1x2x2x128xf32>
    %4 = vector.broadcast %cst_7 : f32 to vector<1x2x2x128xf32>
    %5 = arith.minimumf %4, %3 : vector<1x2x2x128xf32>
    %6 = math.log %5 : vector<1x2x2x128xf32>
    %cst_8 = arith.constant 1.000000e+00 : f32
    %7 = vector.broadcast %cst_8 : f32 to vector<1x2x2x128xf32>
    %8 = arith.subf %7, %5 : vector<1x2x2x128xf32>
    %9 = arith.mulf %8, %8 : vector<1x2x2x128xf32>
    %10 = arith.mulf %1, %6 : vector<1x2x2x128xf32>
    %11 = arith.mulf %10, %9 : vector<1x2x2x128xf32>
    %12 = vector.extract_strided_slice %11 {offsets = [0, 0, 0, 0], sizes = [1, 1, 2, 128], strides = [1, 1, 1, 1]} : vector<1x2x2x128xf32> to vector<1x1x2x128xf32>
    %13 = vector.shape_cast %12 : vector<1x1x2x128xf32> to vector<2x128xf32>
    %14 = vector.shape_cast %13 : vector<2x128xf32> to vector<1x2x128xf32>
    %cst_9 = arith.constant dense<0.000000e+00> : vector<1xf32>
    %15 = vector.multi_reduction <add>, %14, %cst_9 [1, 2] : vector<1x2x128xf32> to vector<1xf32>
    %16 = vector.shape_cast %15 : vector<1xf32> to vector<1x1x1xf32>
    %17 = vector.extract %16[0, 0, 0] : f32 from vector<1x1x1xf32>
    %18 = vector.extract_strided_slice %11 {offsets = [0, 1, 0, 0], sizes = [1, 1, 2, 128], strides = [1, 1, 1, 1]} : vector<1x2x2x128xf32> to vector<1x1x2x128xf32>
    %19 = vector.shape_cast %18 : vector<1x1x2x128xf32> to vector<2x128xf32>
    %20 = vector.shape_cast %19 : vector<2x128xf32> to vector<1x2x128xf32>
    %cst_10 = arith.constant dense<0.000000e+00> : vector<1xf32>
    %21 = vector.multi_reduction <add>, %20, %cst_10 [1, 2] : vector<1x2x128xf32> to vector<1xf32>
    %22 = vector.shape_cast %21 : vector<1xf32> to vector<1x1x1xf32>
    %23 = vector.extract %22[0, 0, 0] : f32 from vector<1x1x1xf32>
    %cst_11 = arith.constant 3.000000e-01 : f32
    %24 = arith.mulf %cst_11, %17 : f32
    %cst_12 = arith.constant 0.699999988 : f32
    %25 = arith.mulf %cst_12, %23 : f32
    %26 = arith.addf %24, %25 : f32
    %cst_13 = arith.constant 0.000000e+00 : f32
    %27 = arith.subf %cst_13, %26 : f32
    %28 = vector.broadcast %27 : f32 to vector<1x1x1x1xf32>
    %c0_14 = arith.constant 0 : index
    %c0_15 = arith.constant 0 : index
    %c0_16 = arith.constant 0 : index
    %c0_17 = arith.constant 0 : index
    %29 = vector.load %arg4[%c0_14, %c0_15, %c0_16, %c0_17] : memref<1x1x1x1xf32, #tpu.memory_space<vmem>>, vector<1x1x1x1xf32>
    tpu.vector_store %arg4[%c0_14, %c0_15, %c0_16, %c0_17], %28 {strides = array<i32>} : memref<1x1x1x1xf32, #tpu.memory_space<vmem>>, vector<1x1x1x1xf32>,
    return
  }
  func.func @transform_0(%arg0: i32, %arg1: i32) -> (i32, i32, i32, i32) {
    %c0_i32 = arith.constant 0 : i32
    %c0_i32_0 = arith.constant 0 : i32
    %c0_i32_1 = arith.constant 0 : i32
    return %arg0, %c0_i32, %arg1, %c0_i32_0 : i32, i32, i32, i32
  }
  func.func @transform_1(%arg0: i32, %arg1: i32) -> (i32, i32, i32, i32) {
    %c0_i32 = arith.constant 0 : i32
    %c0_i32_0 = arith.constant 0 : i32
    %c0_i32_1 = arith.constant 0 : i32
    return %arg0, %c0_i32, %arg1, %c0_i32_0 : i32, i32, i32, i32
  }
  func.func @transform_2(%arg0: i32, %arg1: i32) -> (i32, i32, i32, i32) {
    %c0_i32 = arith.constant 0 : i32
    %c0_i32_0 = arith.constant 0 : i32
    %c0_i32_1 = arith.constant 0 : i32
    return %arg0, %arg1, %c0_i32, %c0_i32_0 : i32, i32, i32, i32
  }
}

</mosaic_0001>

<bundles_post_ra>
// kernel: tpu_custom_call.1
= control target key start
LH: loop header
LB: loop body
LE: loop exit
PB: predicated region body
PF: predicated region fallthrough
CT: control target
= control target key end

     0   :  { %7 = vsyncpa [#allocation3], 0  ;;  %s710_s0 = inlined_call_operand.hbm [shape: f32[2,4,2,128], index: 0, kind: input, shape index: {}]   ;;  %s711_s1 = inlined_call_operand.hbm [shape: f32[2,4,2,128], index: 1, kind: input, shape index: {}]   ;;  %s712_s2 = inlined_call_operand.vmem [shape: f32[2,1,1,1], index: 2, kind: output, shape index: {}]  }
   0x1   :  { %9 = vsyncpa [#allocation3 + $0x1], 0 }
   0x2   :  { %10 = vsyncpa [#allocation5], 0 }
   0x3   :  { %12 = vsyncpa [#allocation5 + $0x1], 0  ;;  %s602_s9 = smov 0   ;;  %s604_s10 = smov 0  }
   0x4   :  { %s606_s11 = smov 0   ;;  %s608_s12 = smov 0  }
   0x5   :  { %s610_s13 = smov 0   ;;  %s612_s14 = smov 0  }
   0x6 LB: > { %s382_s15 = sadd.s32 4294967295, %s583_s14   ;;  %s30_s16 = sadd.s32 1, %s579_s13  ;;  %s583_s14 = sphi %s612_s14, %s18_s14   ;;  %s579_s13 = sphi %s610_s13, %s720_s13   ;;  %s575_s12 = sphi %s608_s12, %s719_s12   ;;  %s571_s11 = sphi %s606_s11, %s718_s11   ;;  %s567_s10 = sphi %s604_s10, %s717_s10   ;;  %s563_s9 = sphi %s602_s9, %s716_s9  }
   0x7   : > { %p32_p0 = scmp.ge.s32.totalorder %s30_s16, 2  ;;  %s39_s17 = sadd.s32 1, %s571_s11 }
   0x8   : > { %p46_p1 = scmp.ne.s32.totalorder %s571_s11, %s567_s10  ;;  %p47_p2 = scmp.eq.s32.totalorder %s583_s14, 0 }
   0x9   : > { %s722_s16 = smov (%p32_p0, %s30_s16), 0  ;;  %p52_p4 = scmp.ne.s32.totalorder %s567_s10, %s563_s9 }
   0xa   : > { %p638_p3 = por %p47_p2, %p46_p1  ;;  %s34_s19 = ssub.s32 %s579_s13, %s722_s16 }
   0xb   : > { %p53_p5 = scmp.eq.s32.totalorder %s382_s15, 0  ;;  %p37_p6 = scmp.eq.s32.totalorder %s34_s19, 0 }
   0xc   : > { %p414_p8 = scmp.lt.s32.totalorder %s583_s14, 2  ;;  %s654_s22 = sand.u32 1, %s571_s11  }
   0xd   : > { %p645_p7 = por %p53_p5, %p52_p4  ;;  %s397_s23 = sshll.u32 %s579_s13, 3 }
   0xe   : > { %s651_s21 = scalar_select %p37_p6, %s571_s11, %s39_s17  }
   0xf   : > { %s386_s24 = sshll.u32 %s654_s22, 2  ;;  %s142_s27 = scalar_lea.hbm %s710_s0, %s397_s23 }
  0x10   : > { %s143_s28 = sshll.u32 %s142_s27, 4  ;;  %s136_s29 = scalar_lea.vmem [#allocation2], %s386_s24  ;;  %s144_s28 = int_to_ptr.hbm [resolvable:$true] %s143_s28 }
  0x11   : > { %s145_s30 = sshll.u32 %s136_s29, 4  ;;  %p663_p9 = pnand %p414_p8, %p638_p3  ;;  %s146_s30 = int_to_ptr.vmem [resolvable:$true] %s145_s30 }
  0x12   : > { %p392_p10 = scmp.ge.s32.totalorder %s583_s14, 1  ;;  %p176_p11 = scmp.lt.s32.totalorder %s583_s14, 3 }
  0x13   : > { %s133_s4 = scalar_lea.sflag [#allocation3], %s654_s22  ;;  %s585_s5 = smov 32  }
  0x14   : > { %s586_s6 = smov 2   ;;  %p177_p12 = pnand %p392_p10, %p176_p11 }
  0x15   : > { %410 = dma.hbm_to_vmem [thread:$0]  (!%p663_p9), %s144_s28, 64, %s146_s30, %s133_s4, %s585_s5, %s585_s5, %s586_s6  }
  0x16   : > { %s165_s9 = scalar_lea.hbm %s711_s1, %s397_s23  ;;  %s159_s17 = scalar_lea.vmem [#allocation4], %s386_s24 }
  0x17   : > { %s166_s15 = sshll.u32 %s165_s9, 4  ;;  %s168_s18 = sshll.u32 %s159_s17, 4  ;;  %s167_s15 = int_to_ptr.hbm [resolvable:$true] %s166_s15  ;;  %s169_s18 = int_to_ptr.vmem [resolvable:$true] %s168_s18 }
  0x18   : > { %s156_s19 = scalar_lea.sflag [#allocation5], %s654_s22  ;;  %180 = sbr.rel (%p177_p12) target bundleno = 245 (0xf5), region = 28 }
  0x19   : > { %413 = dma.hbm_to_vmem [thread:$0]  (!%p663_p9), %s167_s15, 64, %s169_s18, %s156_s19, %s585_s5, %s585_s5, %s586_s6  }
  0x1a   : > { %s182_s25 = sand.u32 (!%p177_p12), 1, %s567_s10  }
  0x1b   : > { %s393_s26 = sshll.u32 (!%p177_p12), %s182_s25, 2  ;;  %s183_s27 = scalar_lea.sflag (!%p177_p12), [#allocation3], %s182_s25 }
  0x1c   : > { %s186_s28 = scalar_lea.vmem (!%p177_p12), [#allocation2], %s393_s26 }
  0x1d   : > { %554 = dma.done.wait (%p645_p7), %s183_s27, 64  }
  0x1e   : > { %556 = vsyncadd (%p645_p7), %s183_s27, 4294967232  ;;  %s193_s23 = scalar_lea.sflag [#allocation5], %s182_s25  ;;  %s196_s24 = scalar_lea.vmem [#allocation4], %s393_s26 }
  0x1f   : > { %558 = dma.done.wait (%p645_p7), %s193_s23, 64  }
  0x20   : > { %560 = vsyncadd (%p645_p7), %s193_s23, 4294967232  ;;  %v230_v0 = vld [vmem:[%s186_s28] sm:$0x3]  ;;  %v231_v1 = vld [vmem:[%s186_s28 + $0x2] sm:$0x3]  ;;  %vm250_vm0 = vcmask 1041408  }
  0x21   : > { %v234_v2 = vmax.f32 %v230_v0, 1e-07  ;;  %v235_v3 = vmax.f32 %v231_v1, 1e-07  ;;  %v232_v8 = vld [vmem:[%s196_s24] sm:$0x3] }
  0x22   : > { %v233_v13 = vld [vmem:[%s196_s24 + $0x2] sm:$0x3]  ;;  %p224_p13 = scmp.lt.s32.totalorder %s575_s12, 1  ;;  %vm276_vm1 = vcmask 0  }
  0x23   : > { %v236_v4 = vmin.f32 %v234_v2, 0.9999999  ;;  %v237_v5 = vmin.f32 %v235_v3, 0.9999999 }
  0x24   : > { %s724_s12 = smov (!%p224_p13, %s575_s12), 1 }
  0x25   : > { %465 = vlog2.f32 %v236_v4  ;;  %v242_v6 = vsub.f32 1.0, %v236_v4  ;;  %v243_v12 = vsub.f32 1.0, %v237_v5  ;;  %s229_s6 = scalar_lea.vmem %s712_s2, %s724_s12 }
  0x26   : > { %467 = vlog2.f32 %v237_v5 }
  0x27   : > { %v244_v11 = vmul.f32 %v242_v6, %v242_v6  ;;  %v245_v17 = vmul.f32 %v243_v12, %v243_v12 }
  0x2b   : > { %v466_v7 = vpop.eup %465 }
  0x2c   : > { %v468_v9 = vpop.eup %467  ;;  %v239_v10 = vmul.f32 0.6931472, %v466_v7 }
  0x2d   : > { %v241_v14 = vmul.f32 0.6931472, %v468_v9 }
  0x2e   : > { %v246_v15 = vmul.f32 %v239_v10, %v232_v8 }
  0x2f   : > { %v247_v18 = vmul.f32 %v241_v14, %v233_v13 }
  0x30   : > { %v248_v16 = vmul.f32 %v246_v15, %v244_v11 }
  0x31   : > { %v249_v20 = vmul.f32 %v247_v18, %v245_v17 }
  0x32   : > { %v251_v19 = vsel %vm250_vm0, %v248_v16, 0.0 }
  0x33   : > { %252 = vadd.xlane.f32.xlu0 %v251_v19  ;;  %v261_v21 = vsel %vm250_vm0, %v249_v20, 0.0 }
  0x3b   : > { %262 = vadd.xlane.f32.xlu0 %v261_v21 }
  0xa6   : > { %v253_v22 = vpop.xlane.xlu0 %252 }
  0xa7   : > { %v254_v23 = vrot.slane %v253_v22, 4 }
  0xa9   : > { %v255_v24 = vadd.f32 %v254_v23, %v253_v22 }
  0xab   : > { %v256_v25 = vrot.slane %v255_v24, 2 }
  0xad   : > { %v257_v26 = vadd.f32 %v256_v25, %v255_v24 }
  0xae   : > { %v263_v27 = vpop.xlane.xlu0 %262 }
  0xaf   : > { %v264_v28 = vrot.slane %v263_v27, 4  ;;  %v258_v29 = vrot.slane %v257_v26, 1 }
  0xb1   : > { %v265_v30 = vadd.f32 %v264_v28, %v263_v27  ;;  %v259_v31 = vadd.f32 %v258_v29, %v257_v26 }
  0xb3   : > { %v266_v32 = vrot.slane %v265_v30, 2  ;;  %399 = vpush %v259_v31 }
  0xb5   : > { %v267_v33 = vadd.f32 %v266_v32, %v265_v30 }
  0xb7   : > { %v268_v34 = vrot.slane %v267_v33, 1 }
  0xb9   : > { %v269_v35 = vadd.f32 %v268_v34, %v267_v33 }
  0xbb   : > { %401 = vpush %v269_v35 }
  0xe4   : > { %s400_s20 = spop %399 }
  0xe5   : > { %s271_s22 = smul.f32 0.3, %s400_s20 }
  0xec   : > { %s402_s29 = spop %401 }
  0xed   : > { %s272_s30 = smul.f32 0.7, %s402_s29 }
  0xef   : > { %s273_s3 = sadd.f32 %s272_s30, %s271_s22 }
  0xf1   : > { %s274_s7 = ssub.f32 0.0, %s273_s3 }
  0xf3   : > { %v275_v36 = vstv %s274_s7 }
  0xf4   : > { %277 = vst.msk [vmem:[%s229_s6] sm:$0x1] %vm276_vm1, %v275_v36 }
  0xf5 PF: > { %s18_s14 = sadd.s32 1, %s583_s14   ;;  %s716_s9 = smov %s567_s10 }
  0xf6   : > { %p15_p0 = scmp.ge.s32.totalorder %s18_s14, 4   ;;  %s717_s10 = smov %s571_s11 }
  0xf7   : > { %s718_s11 = smov %s651_s21  ;;  %s719_s12 = smov %s579_s13 }
  0xf8   : > { %s720_s13 = smov %s722_s16  ;;  %17 = sbr.rel (!%p15_p0) target bundleno = 6 (0x6), region = 81 }
  0xfd   :  { %301 = vsyncpa [#allocation3], 1 }
  0xfe   :  { %303 = vsyncpa [#allocation3 + $0x1], 1 }
  0xff   :  { %304 = vsyncpa [#allocation5], 1 }
 0x100   :  { %306 = vsyncpa [#allocation5 + $0x1], 1 }

</bundles_post_ra>
